<compile_context>
chip_gen: v5e
topology: v5e:2x2
jax: 0.10.0
libtpu: 0.0.40
codegen_flags: <defaults>
</compile_context>

<pallas_src>
import math

import jax
import jax.numpy as jnp
from jax.experimental import pallas as pl
from jax.experimental.pallas import tpu as pltpu

# ---------------- configuration (small, consistent with the forward) ---------
B, T, M = 2, 16, 32          # batch, frames, mel bins
H = 32                       # denoiser hidden width
C = 4                        # classifier ("cls_pred") classes
NUM_TIMESTEPS = 4            # diffusion steps
BT = B * T


# =============================================================================
# Fused kernel: q_sample + denoiser + attention + classifier + posterior
# =============================================================================
def _fused_kernel(coef_ref, mel_ref, cond_ref, noise_ref, tbias_ref,
                  wpack_ref, wout_ref, bout_ref,
                  xpack_ref, attn_ref, cls_ref):
    # coef_ref (VMEM, (BT, 8)) columns:
    #   [sqrt_acp, sqrt_1m_acp, sqrt_acp_prev, sqrt_1m_acp_prev,
    #    post_c1, post_c2, post_sigma*(t>0), 0]
    x0 = mel_ref[...]              # (BT, M)  ground-truth mels (rows = b*T + t)
    cond = cond_ref[...]           # (BT, M)  coarse mel condition
    n_t = noise_ref[0]             # (BT, M)
    n_prev = noise_ref[1]          # (BT, M)
    n_post = noise_ref[2]          # (BT, M)
    coefs = coef_ref[...]          # (BT, 8)

    c_sqrt_acp = coefs[:, 0:1]
    c_sqrt_om = coefs[:, 1:2]
    c_sqrt_acp_p = coefs[:, 2:3]
    c_sqrt_om_p = coefs[:, 3:4]
    c_post1 = coefs[:, 4:5]
    c_post2 = coefs[:, 5:6]
    c_sigma = coefs[:, 6:7]

    # ---- q_sample: x_t and x_{t-1} ------------------------------------------
    x_t = c_sqrt_acp * x0 + c_sqrt_om * n_t                         # (BT, M)
    x_t_prev = c_sqrt_acp_p * x0 + c_sqrt_om_p * n_prev             # (BT, M)

    # ---- denoiser: packed MXU projection ------------------------------------
    # x_t @ [W_in | W_q | 0] + cond @ [W_cond | 0 | W_k]  ->  [h_pre | Q | K]
    proj = (jnp.dot(x_t, wpack_ref[0], preferred_element_type=jnp.float32)
            + jnp.dot(cond, wpack_ref[1],
                      preferred_element_type=jnp.float32))          # (BT, 3H)
    h = jnp.maximum(proj[:, :H] + tbias_ref[...], 0.0)              # (BT, H)
    q = proj[:, H:2 * H]                                            # (BT, H)
    k = proj[:, 2 * H:]                                             # (BT, H)

    # x_0 prediction + per-row classifier contributions in one dot.
    out2 = (jnp.dot(h, wout_ref[...], preferred_element_type=jnp.float32)
            + bout_ref[...])                                        # (BT, M+C)
    x0p = out2[:, :M]                                               # (BT, M)
    cls_rows = out2[:, M:]                                          # (BT, C)

    # ---- posterior q(x_{t-1} | x_t, x_0^pred) -------------------------------
    xtpp = c_post1 * x0p + c_post2 * x_t + c_sigma * n_post         # (BT, M)

    xpack_ref[0] = x_t
    xpack_ref[1] = x_t_prev
    xpack_ref[2] = x0p
    xpack_ref[3] = xtpp

    # ---- attention A = softmax(Q K^T / sqrt(H)) and classifier (per batch) ---
    inv_sqrt_h = 1.0 / math.sqrt(H)
    inv_t = 1.0 / T
    for b in range(B):
        qb = q[b * T:(b + 1) * T, :]                                # (T, H)
        kb = k[b * T:(b + 1) * T, :]                                # (T, H)
        scores = jax.lax.dot_general(
            qb, kb, dimension_numbers=(((1,), (1,)), ((), ())),
            preferred_element_type=jnp.float32) * inv_sqrt_h        # (T, T)
        mmax = jnp.max(scores, axis=-1, keepdims=True)
        e = jnp.exp(scores - mmax)
        attn_ref[b * T:(b + 1) * T, :] = (
            e * pl.reciprocal(jnp.sum(e, axis=-1, keepdims=True), approx=True))
        # mean-pool over time commutes with the linear classifier head.
        cls_ref[b:b + 1, :] = (
            jnp.sum(cls_rows[b * T:(b + 1) * T, :], axis=0, keepdims=True)
            * inv_t)


def fused_step(coef_rows, mel_rows, cond_rows, noise3, tbias_rows,
               w_pack, w_out_pack, b_out_pack):
    def full2(shape):
        return pl.BlockSpec(shape, lambda i: (0, 0))

    def full3(shape):
        return pl.BlockSpec(shape, lambda i: (0, 0, 0))

    in_specs = [
        full2((BT, 8)),             # per-row diffusion/posterior coefficients
        full2((BT, M)),             # mels (rows)
        full2((BT, M)),             # coarse (rows)
        full3((3, BT, M)),          # stacked noises (q / prev / posterior)
        full2((BT, H)),             # temb@W_t + b1, repeated per frame
        full3((2, M, 3 * H)),       # packed [W_in|W_q|0] / [W_cond|0|W_k]
        full2((H, M + C)),          # packed W_out/W_cls
        full2((1, M + C)),          # packed b2/b_cls
    ]
    out_specs = [
        full3((4, BT, M)),          # packed x_t / x_{t-1} / x0_pred / x_{t-1}_pred
        full2((BT, T)),             # attention A
        full2((B, C)),              # cls_pred
    ]
    out_shape = [
        jax.ShapeDtypeStruct((4, BT, M), jnp.float32),
        jax.ShapeDtypeStruct((BT, T), jnp.float32),
        jax.ShapeDtypeStruct((B, C), jnp.float32),
    ]
    return pl.pallas_call(
        _fused_kernel,
        grid=(1,),
        in_specs=in_specs,
        out_specs=out_specs,
        out_shape=out_shape,
        compiler_params=pltpu.CompilerParams(
            dimension_semantics=("arbitrary",)),
    )(coef_rows, mel_rows, cond_rows, noise3, tbias_rows,
      w_pack, w_out_pack, b_out_pack)


# =============================================================================
# Plain-JAX glue: schedule, params, and the DiffGANHDT forward wrapper
# =============================================================================
def make_schedule(n):
    betas = jnp.linspace(1e-4, 0.05, n, dtype=jnp.float32)
    alphas = 1.0 - betas
    acp = jnp.cumprod(alphas)
    acp_prev = jnp.concatenate([jnp.ones((1,), jnp.float32), acp[:-1]])
    return {
        "sqrt_acp": jnp.sqrt(acp),
        "sqrt_om": jnp.sqrt(1.0 - acp),
        "sqrt_acp_prev": jnp.sqrt(acp_prev),
        "sqrt_om_prev": jnp.sqrt(1.0 - acp_prev),
        "post_coef1": betas * jnp.sqrt(acp_prev) / (1.0 - acp),
        "post_coef2": (1.0 - acp_prev) * jnp.sqrt(alphas) / (1.0 - acp),
        "post_sigma": jnp.sqrt(
            jnp.maximum(betas * (1.0 - acp_prev) / (1.0 - acp), 1e-20)),
    }


def init_params(key):
    ks = jax.random.split(key, 8)

    def w(k, shape, fan_in):
        return jax.random.normal(k, shape, jnp.float32) / math.sqrt(fan_in)

    W_in = w(ks[0], (M, H), M)
    W_cond = w(ks[1], (M, H), M)
    W_t = w(ks[2], (H, H), H)
    b1 = jnp.zeros((1, H), jnp.float32)
    W_out = w(ks[3], (H, M), H)
    b2 = jnp.zeros((1, M), jnp.float32)
    W_q = w(ks[4], (M, H), M)
    W_k = w(ks[5], (M, H), M)
    W_cls = w(ks[6], (H, C), H)
    b_cls = jnp.zeros((1, C), jnp.float32)
    t_table = w(ks[7], (NUM_TIMESTEPS, H), 1.0) * 0.1   # learned step embedding

    # Packed single-projection weights, block-structured so
    #   x_t @ Wa + cond @ Wb = [x_t@W_in + cond@W_cond | x_t@W_q | cond@W_k]
    Wa = jnp.zeros((M, 3 * H), jnp.float32)
    Wa = Wa.at[:, :H].set(W_in).at[:, H:2 * H].set(W_q)
    Wb = jnp.zeros((M, 3 * H), jnp.float32)
    Wb = Wb.at[:, :H].set(W_cond).at[:, 2 * H:].set(W_k)
    W_pack = jnp.stack([Wa, Wb], axis=0)                    # (2, M, 3H)
    W_out_pack = jnp.concatenate([W_out, W_cls], axis=1)    # (H, M + C)
    b_out_pack = jnp.concatenate([b2, b_cls], axis=1)       # (1, M + C)

    params = {"W_pack": W_pack, "W_out_pack": W_out_pack,
              "b_out_pack": b_out_pack, "W_t": W_t, "b1": b1}
    return params, t_table


def diffgan_hdt_forward(mels, coarse, params, t_table, sched, rng):
    """Mirrors DiffGANHDT.forward for model == 'naive'."""
    k_t, k_n = jax.random.split(rng, 2)
    t = jax.random.randint(k_t, (B,), 0, NUM_TIMESTEPS)         # diffusion_step
    noise3 = jax.random.normal(k_n, (3, BT, M), jnp.float32)    # q / prev / post

    nz = (t > 0).astype(jnp.float32)    # no posterior noise injected at t == 0
    coefs = jnp.stack([
        sched["sqrt_acp"][t], sched["sqrt_om"][t],
        sched["sqrt_acp_prev"][t], sched["sqrt_om_prev"][t],
        sched["post_coef1"][t], sched["post_coef2"][t],
        sched["post_sigma"][t] * nz, jnp.zeros_like(nz),
    ], axis=-1)                                                 # (B, 8)
    coef_rows = jnp.repeat(coefs, T, axis=0)                    # (B*T, 8)

    temb = t_table[t]                                           # (B, H)
    tbias = temb @ params["W_t"] + params["b1"]                 # (B, H) hoisted
    tbias_rows = jnp.repeat(tbias, T, axis=0)                   # (B*T, H)

    xpack, attn, cls_pred = fused_step(
        coef_rows, mels.reshape(BT, M), coarse.reshape(BT, M), noise3,
        tbias_rows, params["W_pack"], params["W_out_pack"],
        params["b_out_pack"])

    x_ts = xpack[0].reshape(B, T, M)
    x_t_prevs = xpack[1].reshape(B, T, M)
    output = xpack[2].reshape(B, T, M)
    x_t_prev_preds = xpack[3].reshape(B, T, M)
    A = attn.reshape(B, T, T)
    return [output, A, cls_pred, (x_ts, x_t_prevs, x_t_prev_preds), t]


if __name__ == "__main__":
    key = jax.random.PRNGKey(0)
    k_mel, k_coarse, k_params, k_fwd = jax.random.split(key, 4)

    mels = jax.random.normal(k_mel, (B, T, M), jnp.float32)
    coarse = jax.random.normal(k_coarse, (B, T, M), jnp.float32)

    params, t_table = init_params(k_params)
    sched = make_schedule(NUM_TIMESTEPS)

    out = diffgan_hdt_forward(mels, coarse, params, t_table, sched, k_fwd)
    jax.block_until_ready(out)

    output, A, cls_pred, (x_ts, x_t_prevs, x_t_prev_preds), t = out
    assert output.shape == (B, T, M)
    assert A.shape == (B, T, T)
    assert cls_pred.shape == (B, C)
    assert x_ts.shape == x_t_prevs.shape == x_t_prev_preds.shape == (B, T, M)
    assert t.shape == (B,)
    assert bool(jnp.all(jnp.isfinite(output)))
    assert bool(jnp.all(jnp.isfinite(A)))
    assert bool(jnp.all(jnp.isfinite(cls_pred)))

    # Light correctness check on the purely elementwise q_sample path (same rng
    # split order as the wrapper, so the noise / t match exactly).
    k_t, k_n = jax.random.split(k_fwd, 2)
    t_ref = jax.random.randint(k_t, (B,), 0, NUM_TIMESTEPS)
    noise3_ref = jax.random.normal(k_n, (3, BT, M), jnp.float32)
    x_t_ref = (sched["sqrt_acp"][t_ref][:, None, None] * mels
               + sched["sqrt_om"][t_ref][:, None, None]
               * noise3_ref[0].reshape(B, T, M))
    assert bool(jnp.allclose(x_ts, x_t_ref, rtol=1e-5, atol=1e-5))

    print("KERNEL_OK")
</pallas_src>

<mosaic_0001>
module attributes {stable_mosaic.version = 11 : i64} {
  func.func @_fused_kernel(%arg0: i32, %arg1: memref<32x8xf32, #tpu.memory_space<vmem>>, %arg2: memref<32x32xf32, #tpu.memory_space<vmem>>, %arg3: memref<32x32xf32, #tpu.memory_space<vmem>>, %arg4: memref<3x32x32xf32, #tpu.memory_space<vmem>>, %arg5: memref<32x32xf32, #tpu.memory_space<vmem>>, %arg6: memref<2x32x96xf32, #tpu.memory_space<vmem>>, %arg7: memref<32x36xf32, #tpu.memory_space<vmem>>, %arg8: memref<1x36xf32, #tpu.memory_space<vmem>>, %arg9: memref<4x32x32xf32, #tpu.memory_space<vmem>>, %arg10: memref<32x16xf32, #tpu.memory_space<vmem>>, %arg11: memref<2x4xf32, #tpu.memory_space<vmem>>) attributes {dimension_semantics = [#tpu.dimension_semantics<arbitrary>], iteration_bounds = array<i64: 1>, scalar_prefetch = 0 : i64, scratch_operands = 0 : i64, tpu.core_type = #tpu.core_type<tc>, window_params = [{pipeline_mode = #tpu.pipeline_mode<synchronous>, transform_indices = @transform_0, window_bounds = array<i64: 32, 8>}, {pipeline_mode = #tpu.pipeline_mode<synchronous>, transform_indices = @transform_1, window_bounds = array<i64: 32, 32>}, {pipeline_mode = #tpu.pipeline_mode<synchronous>, transform_indices = @transform_2, window_bounds = array<i64: 32, 32>}, {pipeline_mode = #tpu.pipeline_mode<synchronous>, transform_indices = @transform_3, window_bounds = array<i64: 3, 32, 32>}, {pipeline_mode = #tpu.pipeline_mode<synchronous>, transform_indices = @transform_4, window_bounds = array<i64: 32, 32>}, {pipeline_mode = #tpu.pipeline_mode<synchronous>, transform_indices = @transform_5, window_bounds = array<i64: 2, 32, 96>}, {pipeline_mode = #tpu.pipeline_mode<synchronous>, transform_indices = @transform_6, window_bounds = array<i64: 32, 36>}, {pipeline_mode = #tpu.pipeline_mode<synchronous>, transform_indices = @transform_7, window_bounds = array<i64: 1, 36>}, {pipeline_mode = #tpu.pipeline_mode<synchronous>, transform_indices = @transform_8, window_bounds = array<i64: 4, 32, 32>}, {pipeline_mode = #tpu.pipeline_mode<synchronous>, transform_indices = @transform_9, window_bounds = array<i64: 32, 16>}, {pipeline_mode = #tpu.pipeline_mode<synchronous>, transform_indices = @transform_10, window_bounds = array<i64: 2, 4>}]} {
    %c0 = arith.constant 0 : index
    %c0_0 = arith.constant 0 : index
    %0 = vector.load %arg2[%c0, %c0_0] : memref<32x32xf32, #tpu.memory_space<vmem>>, vector<32x32xf32>
    %c0_1 = arith.constant 0 : index
    %c0_2 = arith.constant 0 : index
    %1 = vector.load %arg3[%c0_1, %c0_2] : memref<32x32xf32, #tpu.memory_space<vmem>>, vector<32x32xf32>
    %c0_3 = arith.constant 0 : index
    %c0_4 = arith.constant 0 : index
    %c0_5 = arith.constant 0 : index
    %2 = vector.load %arg4[%c0_3, %c0_4, %c0_5] : memref<3x32x32xf32, #tpu.memory_space<vmem>>, vector<1x32x32xf32>
    %3 = vector.shape_cast %2 : vector<1x32x32xf32> to vector<32x32xf32>
    %c1 = arith.constant 1 : index
    %c0_6 = arith.constant 0 : index
    %c0_7 = arith.constant 0 : index
    %4 = vector.load %arg4[%c1, %c0_6, %c0_7] : memref<3x32x32xf32, #tpu.memory_space<vmem>>, vector<1x32x32xf32>
    %5 = vector.shape_cast %4 : vector<1x32x32xf32> to vector<32x32xf32>
    %c2 = arith.constant 2 : index
    %c0_8 = arith.constant 0 : index
    %c0_9 = arith.constant 0 : index
    %6 = vector.load %arg4[%c2, %c0_8, %c0_9] : memref<3x32x32xf32, #tpu.memory_space<vmem>>, vector<1x32x32xf32>
    %7 = vector.shape_cast %6 : vector<1x32x32xf32> to vector<32x32xf32>
    %c0_10 = arith.constant 0 : index
    %c0_11 = arith.constant 0 : index
    %8 = vector.load %arg1[%c0_10, %c0_11] : memref<32x8xf32, #tpu.memory_space<vmem>>, vector<32x8xf32>
    %9 = vector.extract_strided_slice %8 {offsets = [0, 0], sizes = [32, 1], strides = [1, 1]} : vector<32x8xf32> to vector<32x1xf32>
    %10 = vector.extract_strided_slice %8 {offsets = [0, 1], sizes = [32, 1], strides = [1, 1]} : vector<32x8xf32> to vector<32x1xf32>
    %11 = vector.extract_strided_slice %8 {offsets = [0, 2], sizes = [32, 1], strides = [1, 1]} : vector<32x8xf32> to vector<32x1xf32>
    %12 = vector.extract_strided_slice %8 {offsets = [0, 3], sizes = [32, 1], strides = [1, 1]} : vector<32x8xf32> to vector<32x1xf32>
    %13 = vector.extract_strided_slice %8 {offsets = [0, 4], sizes = [32, 1], strides = [1, 1]} : vector<32x8xf32> to vector<32x1xf32>
    %14 = vector.extract_strided_slice %8 {offsets = [0, 5], sizes = [32, 1], strides = [1, 1]} : vector<32x8xf32> to vector<32x1xf32>
    %15 = vector.extract_strided_slice %8 {offsets = [0, 6], sizes = [32, 1], strides = [1, 1]} : vector<32x8xf32> to vector<32x1xf32>
    %16 = vector.broadcast %9 : vector<32x1xf32> to vector<32x32xf32>
    %17 = arith.mulf %16, %0 : vector<32x32xf32>
    %18 = vector.broadcast %10 : vector<32x1xf32> to vector<32x32xf32>
    %19 = arith.mulf %18, %3 : vector<32x32xf32>
    %20 = arith.addf %17, %19 : vector<32x32xf32>
    %21 = vector.broadcast %11 : vector<32x1xf32> to vector<32x32xf32>
    %22 = arith.mulf %21, %0 : vector<32x32xf32>
    %23 = vector.broadcast %12 : vector<32x1xf32> to vector<32x32xf32>
    %24 = arith.mulf %23, %5 : vector<32x32xf32>
    %25 = arith.addf %22, %24 : vector<32x32xf32>
    %c0_12 = arith.constant 0 : index
    %c0_13 = arith.constant 0 : index
    %c0_14 = arith.constant 0 : index
    %26 = vector.load %arg6[%c0_12, %c0_13, %c0_14] : memref<2x32x96xf32, #tpu.memory_space<vmem>>, vector<1x32x96xf32>
    %27 = vector.shape_cast %26 : vector<1x32x96xf32> to vector<32x96xf32>
    %cst = arith.constant dense<0.000000e+00> : vector<32x96xf32>
    %28 = tpu.matmul %20, %27, %cst {dimension_numbers = #tpu.dot_dimension_numbers<[1], [0], [0], [1], [0, 0, 1, 1], [], []>} : vector<32x32xf32>, vector<32x96xf32>, vector<32x96xf32> -> vector<32x96xf32>
    %c1_15 = arith.constant 1 : index
    %c0_16 = arith.constant 0 : index
    %c0_17 = arith.constant 0 : index
    %29 = vector.load %arg6[%c1_15, %c0_16, %c0_17] : memref<2x32x96xf32, #tpu.memory_space<vmem>>, vector<1x32x96xf32>
    %30 = vector.shape_cast %29 : vector<1x32x96xf32> to vector<32x96xf32>
    %cst_18 = arith.constant dense<0.000000e+00> : vector<32x96xf32>
    %31 = tpu.matmul %1, %30, %cst_18 {dimension_numbers = #tpu.dot_dimension_numbers<[1], [0], [0], [1], [0, 0, 1, 1], [], []>} : vector<32x32xf32>, vector<32x96xf32>, vector<32x96xf32> -> vector<32x96xf32>
    %32 = arith.addf %28, %31 : vector<32x96xf32>
    %33 = vector.extract_strided_slice %32 {offsets = [0, 0], sizes = [32, 32], strides = [1, 1]} : vector<32x96xf32> to vector<32x32xf32>
    %c0_19 = arith.constant 0 : index
    %c0_20 = arith.constant 0 : index
    %34 = vector.load %arg5[%c0_19, %c0_20] : memref<32x32xf32, #tpu.memory_space<vmem>>, vector<32x32xf32>
    %35 = arith.addf %33, %34 : vector<32x32xf32>
    %cst_21 = arith.constant 0.000000e+00 : f32
    %36 = vector.broadcast %cst_21 : f32 to vector<32x32xf32>
    %37 = arith.maximumf %35, %36 : vector<32x32xf32>
    %38 = vector.extract_strided_slice %32 {offsets = [0, 32], sizes = [32, 32], strides = [1, 1]} : vector<32x96xf32> to vector<32x32xf32>
    %39 = vector.extract_strided_slice %32 {offsets = [0, 64], sizes = [32, 32], strides = [1, 1]} : vector<32x96xf32> to vector<32x32xf32>
    %c0_22 = arith.constant 0 : index
    %c0_23 = arith.constant 0 : index
    %40 = vector.load %arg7[%c0_22, %c0_23] : memref<32x36xf32, #tpu.memory_space<vmem>>, vector<32x36xf32>
    %cst_24 = arith.constant dense<0.000000e+00> : vector<32x36xf32>
    %41 = tpu.matmul %37, %40, %cst_24 {dimension_numbers = #tpu.dot_dimension_numbers<[1], [0], [0], [1], [0, 0, 1, 1], [], []>} : vector<32x32xf32>, vector<32x36xf32>, vector<32x36xf32> -> vector<32x36xf32>
    %c0_25 = arith.constant 0 : index
    %c0_26 = arith.constant 0 : index
    %42 = vector.load %arg8[%c0_25, %c0_26] : memref<1x36xf32, #tpu.memory_space<vmem>>, vector<1x36xf32>
    %43 = vector.broadcast %42 : vector<1x36xf32> to vector<32x36xf32>
    %44 = arith.addf %41, %43 : vector<32x36xf32>
    %45 = vector.extract_strided_slice %44 {offsets = [0, 0], sizes = [32, 32], strides = [1, 1]} : vector<32x36xf32> to vector<32x32xf32>
    %46 = vector.extract_strided_slice %44 {offsets = [0, 32], sizes = [32, 4], strides = [1, 1]} : vector<32x36xf32> to vector<32x4xf32>
    %47 = vector.broadcast %13 : vector<32x1xf32> to vector<32x32xf32>
    %48 = arith.mulf %47, %45 : vector<32x32xf32>
    %49 = vector.broadcast %14 : vector<32x1xf32> to vector<32x32xf32>
    %50 = arith.mulf %49, %20 : vector<32x32xf32>
    %51 = arith.addf %48, %50 : vector<32x32xf32>
    %52 = vector.broadcast %15 : vector<32x1xf32> to vector<32x32xf32>
    %53 = arith.mulf %52, %7 : vector<32x32xf32>
    %54 = arith.addf %51, %53 : vector<32x32xf32>
    %c0_27 = arith.constant 0 : index
    %c0_28 = arith.constant 0 : index
    %c0_29 = arith.constant 0 : index
    %55 = vector.load %arg9[%c0_27, %c0_28, %c0_29] : memref<4x32x32xf32, #tpu.memory_space<vmem>>, vector<1x32x32xf32>
    %56 = vector.shape_cast %55 : vector<1x32x32xf32> to vector<32x32xf32>
    %57 = vector.shape_cast %20 : vector<32x32xf32> to vector<1x32x32xf32>
    tpu.vector_store %arg9[%c0_27, %c0_28, %c0_29], %57 {strides = array<i32>} : memref<4x32x32xf32, #tpu.memory_space<vmem>>, vector<1x32x32xf32>,
    %c1_30 = arith.constant 1 : index
    %c0_31 = arith.constant 0 : index
    %c0_32 = arith.constant 0 : index
    %58 = vector.load %arg9[%c1_30, %c0_31, %c0_32] : memref<4x32x32xf32, #tpu.memory_space<vmem>>, vector<1x32x32xf32>
    %59 = vector.shape_cast %58 : vector<1x32x32xf32> to vector<32x32xf32>
    %60 = vector.shape_cast %25 : vector<32x32xf32> to vector<1x32x32xf32>
    tpu.vector_store %arg9[%c1_30, %c0_31, %c0_32], %60 {strides = array<i32>} : memref<4x32x32xf32, #tpu.memory_space<vmem>>, vector<1x32x32xf32>,
    %c2_33 = arith.constant 2 : index
    %c0_34 = arith.constant 0 : index
    %c0_35 = arith.constant 0 : index
    %61 = vector.load %arg9[%c2_33, %c0_34, %c0_35] : memref<4x32x32xf32, #tpu.memory_space<vmem>>, vector<1x32x32xf32>
    %62 = vector.shape_cast %61 : vector<1x32x32xf32> to vector<32x32xf32>
    %63 = vector.shape_cast %45 : vector<32x32xf32> to vector<1x32x32xf32>
    tpu.vector_store %arg9[%c2_33, %c0_34, %c0_35], %63 {strides = array<i32>} : memref<4x32x32xf32, #tpu.memory_space<vmem>>, vector<1x32x32xf32>,
    %c3 = arith.constant 3 : index
    %c0_36 = arith.constant 0 : index
    %c0_37 = arith.constant 0 : index
    %64 = vector.load %arg9[%c3, %c0_36, %c0_37] : memref<4x32x32xf32, #tpu.memory_space<vmem>>, vector<1x32x32xf32>
    %65 = vector.shape_cast %64 : vector<1x32x32xf32> to vector<32x32xf32>
    %66 = vector.shape_cast %54 : vector<32x32xf32> to vector<1x32x32xf32>
    tpu.vector_store %arg9[%c3, %c0_36, %c0_37], %66 {strides = array<i32>} : memref<4x32x32xf32, #tpu.memory_space<vmem>>, vector<1x32x32xf32>,
    %67 = vector.extract_strided_slice %38 {offsets = [0, 0], sizes = [16, 32], strides = [1, 1]} : vector<32x32xf32> to vector<16x32xf32>
    %68 = vector.extract_strided_slice %39 {offsets = [0, 0], sizes = [16, 32], strides = [1, 1]} : vector<32x32xf32> to vector<16x32xf32>
    %cst_38 = arith.constant dense<0.000000e+00> : vector<16x16xf32>
    %69 = tpu.matmul %67, %68, %cst_38 {dimension_numbers = #tpu.dot_dimension_numbers<[1], [1], [0], [0], [0, 0, 1, 0], [], []>} : vector<16x32xf32>, vector<16x32xf32>, vector<16x16xf32> -> vector<16x16xf32>
    %cst_39 = arith.constant 0.176776692 : f32
    %70 = vector.broadcast %cst_39 : f32 to vector<16x16xf32>
    %71 = arith.mulf %69, %70 : vector<16x16xf32>
    %cst_40 = arith.constant dense<0xFF800000> : vector<16xf32>
    %72 = vector.multi_reduction <maximumf>, %71, %cst_40 [1] : vector<16x16xf32> to vector<16xf32>
    %73 = vector.shape_cast %72 : vector<16xf32> to vector<16x1xf32>
    %74 = vector.broadcast %73 : vector<16x1xf32> to vector<16x16xf32>
    %75 = arith.subf %71, %74 : vector<16x16xf32>
    %76 = math.exp %75 : vector<16x16xf32>
    %cst_41 = arith.constant dense<0.000000e+00> : vector<16xf32>
    %77 = vector.multi_reduction <add>, %76, %cst_41 [1] : vector<16x16xf32> to vector<16xf32>
    %78 = vector.shape_cast %77 : vector<16xf32> to vector<16x1xf32>
    %79 = tpu.reciprocal %78 {approx = true} : vector<16x1xf32> -> vector<16x1xf32>
    %80 = vector.broadcast %79 : vector<16x1xf32> to vector<16x16xf32>
    %81 = arith.mulf %76, %80 : vector<16x16xf32>
    %c0_42 = arith.constant 0 : index
    %c0_43 = arith.constant 0 : index
    %82 = vector.load %arg10[%c0_42, %c0_43] : memref<32x16xf32, #tpu.memory_space<vmem>>, vector<16x16xf32>
    tpu.vector_store %arg10[%c0_42, %c0_43], %81 {strides = array<i32>} : memref<32x16xf32, #tpu.memory_space<vmem>>, vector<16x16xf32>,
    %83 = vector.extract_strided_slice %46 {offsets = [0, 0], sizes = [16, 4], strides = [1, 1]} : vector<32x4xf32> to vector<16x4xf32>
    %cst_44 = arith.constant dense<0.000000e+00> : vector<4xf32>
    %84 = vector.multi_reduction <add>, %83, %cst_44 [0] : vector<16x4xf32> to vector<4xf32>
    %85 = vector.shape_cast %84 : vector<4xf32> to vector<1x4xf32>
    %cst_45 = arith.constant 6.250000e-02 : f32
    %86 = vector.broadcast %cst_45 : f32 to vector<1x4xf32>
    %87 = arith.mulf %85, %86 : vector<1x4xf32>
    %c0_46 = arith.constant 0 : index
    %c0_47 = arith.constant 0 : index
    %88 = vector.load %arg11[%c0_46, %c0_47] : memref<2x4xf32, #tpu.memory_space<vmem>>, vector<1x4xf32>
    tpu.vector_store %arg11[%c0_46, %c0_47], %87 {strides = array<i32>} : memref<2x4xf32, #tpu.memory_space<vmem>>, vector<1x4xf32>,
    %89 = vector.extract_strided_slice %38 {offsets = [16, 0], sizes = [16, 32], strides = [1, 1]} : vector<32x32xf32> to vector<16x32xf32>
    %90 = vector.extract_strided_slice %39 {offsets = [16, 0], sizes = [16, 32], strides = [1, 1]} : vector<32x32xf32> to vector<16x32xf32>
    %cst_48 = arith.constant dense<0.000000e+00> : vector<16x16xf32>
    %91 = tpu.matmul %89, %90, %cst_48 {dimension_numbers = #tpu.dot_dimension_numbers<[1], [1], [0], [0], [0, 0, 1, 0], [], []>} : vector<16x32xf32>, vector<16x32xf32>, vector<16x16xf32> -> vector<16x16xf32>
    %cst_49 = arith.constant 0.176776692 : f32
    %92 = vector.broadcast %cst_49 : f32 to vector<16x16xf32>
    %93 = arith.mulf %91, %92 : vector<16x16xf32>
    %cst_50 = arith.constant dense<0xFF800000> : vector<16xf32>
    %94 = vector.multi_reduction <maximumf>, %93, %cst_50 [1] : vector<16x16xf32> to vector<16xf32>
    %95 = vector.shape_cast %94 : vector<16xf32> to vector<16x1xf32>
    %96 = vector.broadcast %95 : vector<16x1xf32> to vector<16x16xf32>
    %97 = arith.subf %93, %96 : vector<16x16xf32>
    %98 = math.exp %97 : vector<16x16xf32>
    %cst_51 = arith.constant dense<0.000000e+00> : vector<16xf32>
    %99 = vector.multi_reduction <add>, %98, %cst_51 [1] : vector<16x16xf32> to vector<16xf32>
    %100 = vector.shape_cast %99 : vector<16xf32> to vector<16x1xf32>
    %101 = tpu.reciprocal %100 {approx = true} : vector<16x1xf32> -> vector<16x1xf32>
    %102 = vector.broadcast %101 : vector<16x1xf32> to vector<16x16xf32>
    %103 = arith.mulf %98, %102 : vector<16x16xf32>
    %c16 = arith.constant 16 : index
    %c0_52 = arith.constant 0 : index
    %104 = vector.load %arg10[%c16, %c0_52] : memref<32x16xf32, #tpu.memory_space<vmem>>, vector<16x16xf32>
    tpu.vector_store %arg10[%c16, %c0_52], %103 {strides = array<i32>} : memref<32x16xf32, #tpu.memory_space<vmem>>, vector<16x16xf32>,
    %105 = vector.extract_strided_slice %46 {offsets = [16, 0], sizes = [16, 4], strides = [1, 1]} : vector<32x4xf32> to vector<16x4xf32>
    %cst_53 = arith.constant dense<0.000000e+00> : vector<4xf32>
    %106 = vector.multi_reduction <add>, %105, %cst_53 [0] : vector<16x4xf32> to vector<4xf32>
    %107 = vector.shape_cast %106 : vector<4xf32> to vector<1x4xf32>
    %cst_54 = arith.constant 6.250000e-02 : f32
    %108 = vector.broadcast %cst_54 : f32 to vector<1x4xf32>
    %109 = arith.mulf %107, %108 : vector<1x4xf32>
    %c1_55 = arith.constant 1 : index
    %c0_56 = arith.constant 0 : index
    %110 = vector.load %arg11[%c1_55, %c0_56] : memref<2x4xf32, #tpu.memory_space<vmem>>, vector<1x4xf32>
    tpu.vector_store %arg11[%c1_55, %c0_56], %109 {strides = array<i32>} : memref<2x4xf32, #tpu.memory_space<vmem>>, vector<1x4xf32>,
    return
  }
  func.func @transform_0(%arg0: i32) -> (i32, i32) {
    %c0_i32 = arith.constant 0 : i32
    %c0_i32_0 = arith.constant 0 : i32
    %c0_i32_1 = arith.constant 0 : i32
    return %c0_i32, %c0_i32_0 : i32, i32
  }
  func.func @transform_1(%arg0: i32) -> (i32, i32) {
    %c0_i32 = arith.constant 0 : i32
    %c0_i32_0 = arith.constant 0 : i32
    %c0_i32_1 = arith.constant 0 : i32
    return %c0_i32, %c0_i32_0 : i32, i32
  }
  func.func @transform_2(%arg0: i32) -> (i32, i32) {
    %c0_i32 = arith.constant 0 : i32
    %c0_i32_0 = arith.constant 0 : i32
    %c0_i32_1 = arith.constant 0 : i32
    return %c0_i32, %c0_i32_0 : i32, i32
  }
  func.func @transform_3(%arg0: i32) -> (i32, i32, i32) {
    %c0_i32 = arith.constant 0 : i32
    %c0_i32_0 = arith.constant 0 : i32
    %c0_i32_1 = arith.constant 0 : i32
    %c0_i32_2 = arith.constant 0 : i32
    return %c0_i32, %c0_i32_0, %c0_i32_1 : i32, i32, i32
  }
  func.func @transform_4(%arg0: i32) -> (i32, i32) {
    %c0_i32 = arith.constant 0 : i32
    %c0_i32_0 = arith.constant 0 : i32
    %c0_i32_1 = arith.constant 0 : i32
    return %c0_i32, %c0_i32_0 : i32, i32
  }
  func.func @transform_5(%arg0: i32) -> (i32, i32, i32) {
    %c0_i32 = arith.constant 0 : i32
    %c0_i32_0 = arith.constant 0 : i32
    %c0_i32_1 = arith.constant 0 : i32
    %c0_i32_2 = arith.constant 0 : i32
    return %c0_i32, %c0_i32_0, %c0_i32_1 : i32, i32, i32
  }
  func.func @transform_6(%arg0: i32) -> (i32, i32) {
    %c0_i32 = arith.constant 0 : i32
    %c0_i32_0 = arith.constant 0 : i32
    %c0_i32_1 = arith.constant 0 : i32
    return %c0_i32, %c0_i32_0 : i32, i32
  }
  func.func @transform_7(%arg0: i32) -> (i32, i32) {
    %c0_i32 = arith.constant 0 : i32
    %c0_i32_0 = arith.constant 0 : i32
    %c0_i32_1 = arith.constant 0 : i32
    return %c0_i32, %c0_i32_0 : i32, i32
  }
  func.func @transform_8(%arg0: i32) -> (i32, i32, i32) {
    %c0_i32 = arith.constant 0 : i32
    %c0_i32_0 = arith.constant 0 : i32
    %c0_i32_1 = arith.constant 0 : i32
    %c0_i32_2 = arith.constant 0 : i32
    return %c0_i32, %c0_i32_0, %c0_i32_1 : i32, i32, i32
  }
  func.func @transform_9(%arg0: i32) -> (i32, i32) {
    %c0_i32 = arith.constant 0 : i32
    %c0_i32_0 = arith.constant 0 : i32
    %c0_i32_1 = arith.constant 0 : i32
    return %c0_i32, %c0_i32_0 : i32, i32
  }
  func.func @transform_10(%arg0: i32) -> (i32, i32) {
    %c0_i32 = arith.constant 0 : i32
    %c0_i32_0 = arith.constant 0 : i32
    %c0_i32_1 = arith.constant 0 : i32
    return %c0_i32, %c0_i32_0 : i32, i32
  }
}

</mosaic_0001>

<bundles_post_ra>
// kernel: tpu_custom_call.1
= control target key start
LH: loop header
LB: loop body
LE: loop exit
PB: predicated region body
PF: predicated region fallthrough
CT: control target
= control target key end

     0   :  { %16 = vsyncpa [#allocation3], 0  ;;  %s1257_s0 = inlined_call_operand.vmem [shape: f32[32,8], index: 0, kind: input, shape index: {}]   ;;  %s1258_s1 = inlined_call_operand.vmem [shape: f32[32,32], index: 1, kind: input, shape index: {}]   ;;  %s1259_s2 = inlined_call_operand.hbm [shape: f32[32,32], index: 2, kind: input, shape index: {}]   ;;  %s1260_s3 = inlined_call_operand.hbm [shape: f32[3,32,32], index: 3, kind: input, shape index: {}]   ;;  %s1261_s4 = inlined_call_operand.hbm [shape: f32[32,32], index: 4, kind: input, shape index: {}]   ;;  %s1262_s5 = inlined_call_operand.hbm [shape: f32[2,32,96], index: 5, kind: input, shape index: {}]   ;;  %s1263_s6 = inlined_call_operand.hbm [shape: f32[32,36], index: 6, kind: input, shape index: {}]   ;;  %s1264_s7 = inlined_call_operand.vmem [shape: f32[1,36], index: 7, kind: input, shape index: {}]   ;;  %s1265_s8 = inlined_call_operand.hbm [shape: f32[4,32,32], index: 8, kind: output, shape index: {0}]   ;;  %s1266_s9 = inlined_call_operand.vmem [shape: f32[32,16], index: 9, kind: output, shape index: {1}]   ;;  %s1267_s10 = inlined_call_operand.hbm [shape: f32[2,4], index: 10, kind: output, shape index: {2}]  }
   0x1   :  { %17 = vsyncpa [#allocation6], 0 }
   0x2   :  { %18 = vsyncpa [#allocation9], 0 }
   0x3   :  { %19 = vsyncpa [#allocation4], 0 }
   0x4   :  { %20 = vsyncpa [#allocation13], 0  ;;  %s42_s15 = sshll.u32 %s1260_s3, 4  ;;  %s932_s16 = smov [#allocation5]   ;;  %s43_s15 = int_to_ptr.hbm [resolvable:$true] %s42_s15 }
   0x5   :  { %s44_s17 = sshll.u32 %s932_s16, 4  ;;  %s68_s20 = sshll.u32 %s1262_s5, 4  ;;  %s45_s17 = int_to_ptr.vmem [resolvable:$true] %s44_s17  ;;  %s69_s20 = int_to_ptr.hbm [resolvable:$true] %s68_s20 }
   0x6   :  { %s933_s21 = smov 128   ;;  %s934_s22 = smov 8  }
   0x7   :  { %50 = dma.hbm_to_vmem [thread:$0]  %s43_s15, 1536, %s45_s17, [#allocation6], %s933_s21, %s933_s21, %s934_s22  }
   0x8   :  { %s935_s23 = smov [#allocation8]   ;;  %s29_s3 = sshll.u32 %s1259_s2, 4  ;;  %s30_s3 = int_to_ptr.hbm [resolvable:$true] %s29_s3 }
   0x9   :  { %s70_s24 = sshll.u32 %s935_s23, 4  ;;  %s55_s28 = sshll.u32 %s1261_s4, 4  ;;  %s71_s24 = int_to_ptr.vmem [resolvable:$true] %s70_s24  ;;  %s56_s28 = int_to_ptr.hbm [resolvable:$true] %s55_s28 }
   0xa   :  { %76 = dma.hbm_to_vmem [thread:$0]  %s69_s20, 1024, %s71_s24, [#allocation9], %s933_s21, %s933_s21, %s934_s22  }
   0xb   :  { %s936_s29 = smov [#allocation2]   ;;  %s937_s11 = smov [#allocation7]  }
   0xc   :  { %s31_s30 = sshll.u32 %s936_s29, 4  ;;  %s57_s2 = sshll.u32 %s937_s11, 4  ;;  %s32_s30 = int_to_ptr.vmem [resolvable:$true] %s31_s30  ;;  %s58_s2 = int_to_ptr.vmem [resolvable:$true] %s57_s2 }
   0xd   :  { %37 = dma.hbm_to_vmem [thread:$0]  %s30_s3, 512, %s32_s30, [#allocation3], %s933_s21, %s933_s21, %s934_s22  }
   0xe   :  { %s81_s14 = sshll.u32 %s1263_s6, 4  ;;  %s938_s4 = smov [#allocation10]   ;;  %s82_s14 = int_to_ptr.hbm [resolvable:$true] %s81_s14 }
   0xf   :  { %63 = dma.hbm_to_vmem [thread:$0]  %s56_s28, 512, %s58_s2, [#allocation6], %s933_s21, %s933_s21, %s934_s22  }
  0x10   :  { %s83_s15 = sshll.u32 %s938_s4, 4  ;;  %s84_s15 = int_to_ptr.vmem [resolvable:$true] %s83_s15 }
  0x11   :  { %89 = dma.hbm_to_vmem [thread:$0]  %s82_s14, 512, %s84_s15, [#allocation9], %s933_s21, %s933_s21, %s934_s22  }
  0x12   :  { %922 = dma.done.wait [#allocation3], 512  }
  0x13   :  { %923 = vsyncadd [#allocation3], 4294966784 }
  0x14   :  { %924 = dma.done.wait [#allocation6], 2048  }
  0x15   :  { %925 = vsyncadd [#allocation6], 4294965248 }
  0x16   :  { %926 = dma.done.wait [#allocation9], 1536  }
  0x17   :  { %927 = vsyncadd [#allocation9], 4294965760  ;;  %v939_v0 = vmov 0   ;;  %v1038_v1 = vld [vmem:[%s1257_s0 + $0x8] sm:$0xff]  ;;  %v1043_v2 = vld [vmem:[%s1257_s0] sm:$0xff]  ;;  %v940_v4 = vmov 1  }
  0x18   :  { %718 = vset.pattern.permute.xlu1 %v939_v0  ;;  %716 = vset.pattern.permute.xlu0 %v939_v0  ;;  %v1050_v3 = vld [vmem:[%s1257_s0 + $0x10] sm:$0xff]  ;;  %v1059_v5 = vld [vmem:[%s1257_s0 + $0x18] sm:$0xff]  ;;  %v236_v11 = vld [vmem:[#allocation8 + $0x28] sm:$0xff]  ;;  %vm239_vm0 = vcmask 261120   ;;  %v941_v51 = vmov 2   ;;  %s943_s30 = smov 64  }
  0x19   :  { %720 = vset.pattern.permute.xlu2 %v939_v0  ;;  %145 = vperm.xlu1 %718, %v1038_v1   ;;  %v238_v6 = vld [vmem:[#allocation8 + $0x38] sm:$0xff]  ;;  %v237_v8 = vld [vmem:[#allocation8 + $0x30] sm:$0xff]  ;;  %v231_v12 = vld [vmem:[#allocation8 + $0x8] sm:$0xff]  ;;  %vm538_vm1 = vcmask 294144   ;;  %vm513_vm2 = vcmask 130048   ;;  %vm553_vm3 = vcmask 24576  }
  0x1a   :  { %140 = vperm.xlu0 %716, %v1043_v2   ;;  %150 = vperm.xlu2 %720, %v1050_v3   ;;  %v233_v7 = vld [vmem:[#allocation8 + $0x18] sm:$0xff]  ;;  %v232_v9 = vld [vmem:[#allocation8 + $0x10] sm:$0xff]  ;;  %v235_v13 = vld [vmem:[#allocation8 + $0x20] sm:$0xff]  ;;  %s948_s17 = smov [#allocation11]   ;;  %s643_s23 = sshll.u32 %s1265_s8, 4  ;;  %s644_s23 = int_to_ptr.hbm [resolvable:$true] %s643_s23 }
  0x1b   :  { %264 = vmatpush.msra.mxu0 %v238_v6  ;;  %305 = vmatpush.msra.mxu1 %v233_v7  ;;  %v230_v14 = vld [vmem:[#allocation8] sm:$0xff]  ;;  %v1066_v16 = vld [vmem:[%s1258_s1 + $0x10] sm:$0xff]  ;;  %v117_v21 = vld [vmem:[#allocation2 + $0x8] sm:$0xff]  ;;  %s641_s18 = sshll.u32 %s948_s17, 4  ;;  %s949_s24 = smov [#allocation12]   ;;  %s642_s18 = int_to_ptr.vmem [resolvable:$true] %s641_s18 }
  0x1c   :  { %v116_v15 = vld [vmem:[#allocation2] sm:$0xff]  ;;  %v122_v17 = vld [vmem:[#allocation5 + $0x10] sm:$0xff]  ;;  %v119_v26 = vld [vmem:[#allocation2 + $0x18] sm:$0xff]  ;;  %s659_s26 = sshll.u32 %s1267_s10, 4  ;;  %s660_s26 = int_to_ptr.hbm [resolvable:$true] %s659_s26 }
  0x1d   :  { %265 = vmatpush.msra.mxu0 %v237_v8  ;;  %306 = vmatpush.msra.mxu1 %v232_v9  ;;  %v118_v23 = vld [vmem:[#allocation2 + $0x10] sm:$0xff]  ;;  %v1079_v27 = vld [vmem:[%s1258_s1 + $0x8] sm:$0xff]  ;;  %v1084_v28 = vld [vmem:[%s1258_s1] sm:$0xff] }
  0x1e   :  { %v121_v29 = vld [vmem:[#allocation5 + $0x8] sm:$0xff]  ;;  %v120_v30 = vld [vmem:[#allocation5] sm:$0xff]  ;;  %v123_v40 = vld [vmem:[#allocation5 + $0x18] sm:$0xff] }
  0x1f   :  { %266 = vmatpush.msra.mxu0 %v236_v11  ;;  %307 = vmatpush.msra.mxu1 %v231_v12  ;;  %v1102_v41 = vld [vmem:[%s1258_s1 + $0x18] sm:$0xff]  ;;  %v336_v47 = vld [vmem:[#allocation10 + $0x10] sm:$0xff]  ;;  %v335_v48 = vld [vmem:[#allocation10 + $0x8] sm:$0xff]  ;;  %s942_s1 = smov 96  }
  0x20   :  { %v337_v46 = vld [vmem:[#allocation10 + $0x18] sm:$0xff]  ;;  %v334_v49 = vld [vmem:[#allocation10] sm:$0xff]  ;;  %v323_v59 = vld [vmem:[#allocation7 + $0x8] sm:$0xff] }
  0x21   :  { %719 = vset.pattern.permute.xlu1 %v940_v4  ;;  %267 = vmatpush.msra.mxu0 %v235_v13  ;;  %v322_v53 = vld [vmem:[#allocation7] sm:$0xff]  ;;  %v325_v11 = vld [vmem:[#allocation7 + $0x18] sm:$0xff] }
  0x22   :  { %717 = vset.pattern.permute.xlu0 %v940_v4  ;;  %167 = vperm.xlu1 %719, %v1038_v1  }
  0x23   :  { %163 = vperm.xlu0 %717, %v1043_v2   ;;  %721 = vset.pattern.permute.xlu2 %v940_v4  ;;  %v324_v4 = vld [vmem:[#allocation7 + $0x10] sm:$0xff] }
  0x24   :  { %171 = vperm.xlu2 %721, %v1050_v3   ;;  %308 = vmatpush.msra.mxu1 %v230_v14 }
  0x25   :  { %678 = vmatmul.msk.f32.vlgmr.msra.gmra.mxu0 %vm239_vm0, %v116_v15  ;;  %366 = vmatpush.msra.mxu2 %v337_v46  ;;  %v944_v15 = vmov 3  }
  0x27   :  { %367 = vmatpush.msra.mxu2 %v336_v47 }
  0x29   :  { %368 = vmatpush.msra.mxu2 %v335_v48 }
  0x2a   :  { %722 = vset.pattern.permute.xlu1 %v939_v0 }
  0x2b   :  { %155 = vperm.xlu1 %722, %v1059_v5   ;;  %369 = vmatpush.msra.mxu2 %v334_v49 }
  0x2c   :  { %175 = vperm.xlu2 %721, %v1059_v5   ;;  %724 = vset.pattern.permute.xlu0 %v941_v51 }
  0x2d   :  { %679 = vmatmul.msk.f32.gmra.mxu0 %vm239_vm0, %v117_v21 }
  0x33   :  { %725 = vset.pattern.permute.xlu1 %v941_v51 }
  0x34   :  { %723 = vset.pattern.permute.xlu2 %v941_v51 }
  0x35   :  { %680 = vmatmul.msk.f32.gmra.mxu0 %vm239_vm0, %v118_v23 }
  0x3d   :  { %681 = vmatmul.msk.f32.gmra.mxu0 %vm239_vm0, %v119_v26  ;;  %v737_v26 = vld [vmem:[%s1264_s7] ss:$0 sm:$0xff] }
  0x74   :  { %v151_v10 = vpop.permute.xlu2 %150 }
  0x75   :  { %v160_v18 = vmul.f32 %v151_v10, %v1066_v16 }
  0x7e   :  { %v172_v19 = vpop.permute.xlu2 %171 }
  0x7f   :  { %v180_v20 = vmul.f32 %v172_v19, %v122_v17  ;;  %v945_v17 = vmov 4  }
  0x81   :  { %v1070_v22 = vadd.f32 %v180_v20, %v160_v18  ;;  %v946_v18 = vmov 5  }
  0x83   :  { %453 = vst.msk [vmem:[#allocation11 + $0x10] sm:$0xff] %vm239_vm0, %v1070_v22 }
  0x86   :  { %v176_v39 = vpop.permute.xlu2 %175 }
  0x87   :  { %v181_v42 = vmul.f32 %v176_v39, %v123_v40 }
  0x8b   :  { %v146_v25 = vpop.permute.xlu1 %145 }
  0x8c   :  { %v141_v24 = vpop.permute.xlu0 %140  ;;  %v159_v31 = vmul.f32 %v146_v25, %v1079_v27 }
  0x8d   :  { %v158_v34 = vmul.f32 %v141_v24, %v1084_v28 }
  0x94   :  { %v168_v32 = vpop.permute.xlu1 %167 }
  0x95   :  { %v164_v33 = vpop.permute.xlu0 %163  ;;  %v179_v35 = vmul.f32 %v168_v32, %v121_v29 }
  0x96   :  { %v178_v36 = vmul.f32 %v164_v33, %v120_v30 }
  0x97   :  { %v1089_v37 = vadd.f32 %v179_v35, %v159_v31 }
  0x98   :  { %v1091_v38 = vadd.f32 %v178_v36, %v158_v34  ;;  %v126_v34 = vld [vmem:[#allocation5 + $0x28] sm:$0xff] }
  0x99   :  { %452 = vst.msk [vmem:[#allocation11 + $0x8] sm:$0xff] %vm239_vm0, %v1089_v37 }
  0x9a   :  { %682 = vmatmul.msk.f32.vlgmr.msra.gmra.mxu1 %vm239_vm0, %v1091_v38  ;;  %451 = vst.msk [vmem:[#allocation11] sm:$0xff] %vm239_vm0, %v1091_v38 }
  0x9d   :  { %v156_v43 = vpop.permute.xlu1 %155 }
  0x9e   :  { %v161_v44 = vmul.f32 %v156_v43, %v1102_v41 }
  0xa0   :  { %v1105_v45 = vadd.f32 %v181_v42, %v161_v44 }
  0xa2   :  { %683 = vmatmul.msk.f32.gmra.mxu1 %vm239_vm0, %v1089_v37  ;;  %454 = vst.msk [vmem:[#allocation11 + $0x18] sm:$0xff] %vm239_vm0, %v1105_v45  ;;  %v269_v50 = vpop.f32.mrf.mxu0 }
  0xaa   :  { %684 = vmatmul.msk.f32.gmra.mxu1 %vm239_vm0, %v1070_v22  ;;  %v272_v55 = vpop.f32.mrf.mxu0 }
  0xb2   :  { %685 = vmatmul.msk.f32.gmra.mxu1 %vm239_vm0, %v1105_v45  ;;  %v275_v62 = vpop.f32.mrf.mxu0 }
  0xba   :  { %v278_v9 = vpop.f32.mrf.mxu0 }
 0x117   :  { %v310_v52 = vpop.f32.mrf.mxu1 }
 0x118   :  { %v311_v54 = vadd.f32 %v310_v52, %v269_v50  ;;  %v127_v52 = vld [vmem:[#allocation5 + $0x30] sm:$0xff] }
 0x11a   :  { %472 = vrot.lane.b32.xlu2 %v311_v54, %s942_s1  ;;  %476 = vrot.lane.b32.xlu1 %v311_v54, %s943_s30  ;;  %v326_v56 = vadd.f32 %v322_v53, %v311_v54 }
 0x11c   :  { %v330_v57 = vmax.f32 %v326_v56, 0.0 }
 0x11e   :  { %686 = vmatmul.msk.f32.vlgmr.msra.gmra.mxu2 %vm239_vm0, %v330_v57 }
 0x11f   :  { %v313_v58 = vpop.f32.mrf.mxu1 }
 0x120   :  { %v314_v60 = vadd.f32 %v313_v58, %v272_v55 }
 0x122   :  { %478 = vrot.lane.b32.xlu0 %v314_v60, %s943_s30  ;;  %v327_v61 = vadd.f32 %v323_v59, %v314_v60 }
 0x124   :  { %v331_v63 = vmax.f32 %v327_v61, 0.0  ;;  %v125_v61 = vld [vmem:[#allocation5 + $0x20] sm:$0xff] }
 0x126   :  { %687 = vmatmul.msk.f32.gmra.mxu2 %vm239_vm0, %v331_v63 }
 0x127   :  { %v316_v0 = vpop.f32.mrf.mxu1 }
 0x128   :  { %v317_v6 = vadd.f32 %v316_v0, %v275_v62 }
 0x12a   :  { %474 = vrot.lane.b32.xlu0 %v314_v60, %s942_s1  ;;  %561 = vrot.lane.b32.xlu2 %v317_v6, %s943_s30  ;;  %v328_v7 = vadd.f32 %v324_v4, %v317_v6 }
 0x12c   :  { %v332_v8 = vmax.f32 %v328_v7, 0.0 }
 0x12e   :  { %688 = vmatmul.msk.f32.gmra.mxu2 %vm239_vm0, %v332_v8 }
 0x12f   :  { %v319_v10 = vpop.f32.mrf.mxu1 }
 0x130   :  { %v320_v12 = vadd.f32 %v319_v10, %v278_v9 }
 0x132   :  { %557 = vrot.lane.b32.xlu0 %v317_v6, %s942_s1  ;;  %187 = vperm.xlu2 %723, %v1043_v2   ;;  %v329_v13 = vadd.f32 %v325_v11, %v320_v12  ;;  %v128_v6 = vld [vmem:[#allocation5 + $0x38] sm:$0xff]  ;;  %v947_v11 = vmov 6  }
 0x133   :  { %563 = vrot.lane.b32.xlu1 %v320_v12, %s943_s30 }
 0x134   :  { %v333_v14 = vmax.f32 %v329_v13, 0.0 }
 0x136   :  { %689 = vmatmul.msk.f32.gmra.mxu2 %vm239_vm0, %v333_v14 }
 0x13a   :  { %191 = vperm.xlu0 %724, %v1038_v1   ;;  %199 = vperm.xlu2 %723, %v1059_v5  }
 0x13b   :  { %559 = vrot.lane.b32.xlu1 %v320_v12, %s942_s1 }
 0x142   :  { %728 = vset.pattern.permute.xlu0 %v944_v15  ;;  %727 = vset.pattern.permute.xlu2 %v944_v15 }
 0x143   :  { %195 = vperm.xlu1 %725, %v1050_v3   ;;  %215 = vperm.xlu0 %728, %v1050_v3  }
 0x144   :  { %211 = vperm.xlu2 %727, %v1038_v1  }
 0x14b   :  { %726 = vset.pattern.permute.xlu1 %v944_v15  ;;  %731 = vset.pattern.permute.xlu0 %v945_v17 }
 0x14c   :  { %729 = vset.pattern.permute.xlu2 %v945_v17  ;;  %207 = vperm.xlu1 %726, %v1043_v2  }
 0x14d   :  { %396 = vperm.xlu0 %731, %v1059_v5   ;;  %384 = vperm.xlu2 %729, %v1043_v2  }
 0x154   :  { %219 = vperm.xlu1 %726, %v1059_v5  }
 0x155   :  { %392 = vperm.xlu2 %729, %v1050_v3   ;;  %734 = vset.pattern.permute.xlu0 %v947_v11 }
 0x15c   :  { %730 = vset.pattern.permute.xlu1 %v945_v17 }
 0x15d   :  { %733 = vset.pattern.permute.xlu2 %v946_v18  ;;  %388 = vperm.xlu1 %730, %v1038_v1  }
 0x15e   :  { %408 = vperm.xlu2 %733, %v1038_v1  }
 0x165   :  { %732 = vset.pattern.permute.xlu1 %v946_v18 }
 0x166   :  { %416 = vperm.xlu2 %733, %v1059_v5   ;;  %404 = vperm.xlu1 %732, %v1043_v2  }
 0x16e   :  { %412 = vperm.xlu1 %732, %v1050_v3   ;;  %735 = vset.pattern.permute.xlu2 %v947_v11 }
 0x174   :  { %v473_v19 = vpop.permute.xlu2 %472 }
 0x176   :  { %736 = vset.pattern.permute.xlu1 %v947_v11 }
 0x184   :  { %v562_v20 = vpop.permute.xlu2 %561 }
 0x18c   :  { %v188_v23 = vpop.permute.xlu2 %187  ;;  %v477_v24 = vpop.permute.xlu1 %476 }
 0x18d   :  { %v202_v62 = vmul.f32 %v188_v23, %v1084_v28 }
 0x194   :  { %v479_v21 = vpop.permute.xlu0 %478  ;;  %v200_v29 = vpop.permute.xlu2 %199 }
 0x195   :  { %690 = vmatpush.xpose.msk.msra.mxu3 %vm239_vm0, %v479_v21  ;;  %v205_v7 = vmul.f32 %v200_v29, %v1102_v41 }
 0x199   :  { %691 = vmatpush.xpose.msk.msra.mxu3 %vm239_vm0, %v477_v24 }
 0x19c   :  { %v475_v25 = vpop.permute.xlu0 %474  ;;  %692 = vmatmul.msk.f32.vlgmr.msra.gmra.mxu3 %vm239_vm0, %v473_v19 }
 0x19e   :  { %v212_v36 = vpop.permute.xlu2 %211 }
 0x19f   :  { %v223_v40 = vmul.f32 %v212_v36, %v126_v34 }
 0x1a1   :  { %v371_v30 = vpop.f32.mrf.mxu2 }
 0x1a2   :  { %v1145_v31 = vadd.f32 %v737_v26, %v371_v30 }
 0x1a4   :  { %461 = vst.msk [vmem:[#allocation11 + $0x40] sm:$0xff] %vm239_vm0, %v1145_v31  ;;  %v558_v32 = vpop.permute.xlu0 %557  ;;  %693 = vmatmul.msk.f32.gmra.mxu3 %vm239_vm0, %v475_v25  ;;  %v539_v42 = vsel %vm538_vm1, %v1145_v31, 0.0 }
 0x1a5   :  { %v564_v33 = vpop.permute.xlu1 %563 }
 0x1a6   :  { %694 = vmatpush.xpose.msk.msrb.mxu3 %vm239_vm0, %v564_v33 }
 0x1a7   :  { %v385_v24 = vpop.permute.xlu2 %384 }
 0x1a9   :  { %v374_v35 = vpop.f32.mrf.mxu2 }
 0x1aa   :  { %v1151_v39 = vadd.f32 %v737_v26, %v374_v35  ;;  %695 = vmatpush.xpose.msk.msrb.mxu3 %vm239_vm0, %v562_v20 }
 0x1ac   :  { %462 = vst.msk [vmem:[#allocation11 + $0x48] sm:$0xff] %vm239_vm0, %v1151_v39  ;;  %v540_v43 = vsel %vm538_vm1, %v1151_v39, 0.0  ;;  %v192_v44 = vpop.permute.xlu0 %191 }
 0x1ad   :  { %v1160_v46 = vadd.f32 %v540_v43, %v539_v42  ;;  %696 = vmatmul.msk.f32.vlgmr.msrb.gmra.mxu3 %vm239_vm0, %v558_v32  ;;  %v560_v47 = vpop.permute.xlu1 %559  ;;  %v203_v48 = vmul.f32 %v192_v44, %v1079_v27 }
 0x1af   :  { %v227_v49 = vadd.f32 %v223_v40, %v203_v48 }
 0x1b1   :  { %457 = vst.msk [vmem:[#allocation11 + $0x28] sm:$0xff] %vm239_vm0, %v227_v49  ;;  %v377_v50 = vpop.f32.mrf.mxu2  ;;  %v542_v49 = vrot.slane %v1160_v46, 4 }
 0x1b2   :  { %v1165_v51 = vadd.f32 %v737_v26, %v377_v50 }
 0x1b4   :  { %463 = vst.msk [vmem:[#allocation11 + $0x50] sm:$0xff] %vm239_vm0, %v1165_v51  ;;  %v622_v59 = vsel %vm538_vm1, %v1165_v51, 0.0 }
 0x1b5   :  { %697 = vmatmul.msk.f32.gmra.mxu3 %vm239_vm0, %v560_v47  ;;  %v216_v53 = vpop.permute.xlu0 %215  ;;  %v196_v54 = vpop.permute.xlu1 %195 }
 0x1b6   :  { %v224_v55 = vmul.f32 %v216_v53, %v127_v52  ;;  %v204_v56 = vmul.f32 %v196_v54, %v1066_v16  ;;  %v132_v54 = vld [vmem:[#allocation5 + $0x50] sm:$0xff] }
 0x1b8   :  { %v228_v57 = vadd.f32 %v224_v55, %v204_v56  ;;  %v543_v55 = vadd.f32 %v542_v49, %v1160_v46  ;;  %v131_v46 = vld [vmem:[#allocation5 + $0x48] sm:$0xff] }
 0x1b9   :  { %v380_v58 = vpop.f32.mrf.mxu2 }
 0x1ba   :  { %458 = vst.msk [vmem:[#allocation11 + $0x30] sm:$0xff] %vm239_vm0, %v228_v57  ;;  %v1172_v27 = vadd.f32 %v737_v26, %v380_v58  ;;  %v393_v26 = vpop.permute.xlu2 %392 }
 0x1bb   :  { %v401_v56 = vmul.f32 %v393_v26, %v1165_v51 }
 0x1bc   :  { %464 = vst.msk [vmem:[#allocation11 + $0x58] sm:$0xff] %vm239_vm0, %v1172_v27  ;;  %v623_v60 = vsel %vm538_vm1, %v1172_v27, 0.0 }
 0x1bd   :  { %v1181_v63 = vadd.f32 %v623_v60, %v622_v59 }
 0x1be   :  { %v208_v16 = vpop.permute.xlu1 %207 }
 0x1bf   :  { %v222_v0 = vmul.f32 %v208_v16, %v125_v61  ;;  %v1195_v42 = vpop.permute.xlu0 %396  ;;  %v544_v16 = vrot.slane %v543_v55, 2 }
 0x1c1   :  { %v226_v4 = vadd.f32 %v222_v0, %v202_v62 }
 0x1c2   :  { %v409_v30 = vpop.permute.xlu2 %408 }
 0x1c3   :  { %456 = vst.msk [vmem:[#allocation11 + $0x20] sm:$0xff] %vm239_vm0, %v226_v4  ;;  %v420_v51 = vmul.f32 %v409_v30, %v1089_v37 }
 0x1c6   :  { %v220_v8 = vpop.permute.xlu1 %219 }
 0x1c7   :  { %v225_v9 = vmul.f32 %v220_v8, %v128_v6 }
 0x1c9   :  { %v229_v10 = vadd.f32 %v225_v9, %v205_v7  ;;  %v545_v7 = vadd.f32 %v544_v16, %v543_v55 }
 0x1ca   :  { %v1193_v33 = vpop.permute.xlu2 %416 }
 0x1cb   :  { %459 = vst.msk [vmem:[#allocation11 + $0x38] sm:$0xff] %vm239_vm0, %v229_v10 }
 0x1cf   :  { %v389_v25 = vpop.permute.xlu1 %388 }
 0x1d0   :  { %v400_v6 = vmul.f32 %v389_v25, %v1151_v39  ;;  %v625_v39 = vrot.slane %v1181_v63, 4 }
 0x1d2   :  { %v424_v10 = vadd.f32 %v420_v51, %v400_v6 }
 0x1d8   :  { %v405_v29 = vpop.permute.xlu1 %404 }
 0x1d9   :  { %v419_v8 = vmul.f32 %v405_v29, %v1091_v38 }
 0x1e0   :  { %v413_v32 = vpop.permute.xlu1 %412 }
 0x1e1   :  { %v421_v53 = vmul.f32 %v413_v32, %v1070_v22 }
 0x1e3   :  { %v425_v58 = vadd.f32 %v421_v53, %v401_v56 }
 0x21f   :  { %v505_v28 = vpop.f32.mrf.mxu3 }
 0x220   :  { %v511_v12 = vmul.f32 0.17677669, %v505_v28  ;;  %v130_v28 = vld [vmem:[#allocation5 + $0x40] sm:$0xff] }
 0x222   :  { %v514_v13 = vsel %vm513_vm2, %v511_v12, -inf }
 0x223   :  { %515 = vmax.xlane.f32.xlu1 %v514_v13  ;;  %v546_v13 = vrot.slane %v545_v7, 1 }
 0x225   :  { %v547_v38 = vadd.f32 %v546_v13, %v545_v7 }
 0x227   :  { %v508_v14 = vpop.f32.mrf.mxu3 }
 0x228   :  { %v512_v15 = vmul.f32 0.17677669, %v508_v14 }
 0x22a   :  { %v517_v17 = vsel %vm513_vm2, %v512_v15, -inf }
 0x22b   :  { %518 = vmax.xlane.f32.xlu2 %v517_v17 }
 0x230   :  { %v590_v41 = vpop.f32.mrf.mxu3 }
 0x231   :  { %v596_v18 = vmul.f32 0.17677669, %v590_v41 }
 0x233   :  { %v598_v19 = vsel %vm513_vm2, %v596_v18, -inf }
 0x234   :  { %599 = vmax.xlane.f32.xlu0 %v598_v19 }
 0x238   :  { %v593_v20 = vpop.f32.mrf.mxu3 }
 0x239   :  { %v597_v21 = vmul.f32 0.17677669, %v593_v20  ;;  %v626_v20 = vadd.f32 %v625_v39, %v1181_v63 }
 0x23b   :  { %v601_v23 = vsel %vm513_vm2, %v597_v21, -inf }
 0x23c   :  { %602 = vmax.xlane.f32.xlu2 %v601_v23  ;;  %436 = vperm.xlu1 %736, %v1050_v3  }
 0x248   :  { %428 = vperm.xlu0 %734, %v1043_v2  }
 0x254   :  { %432 = vperm.xlu2 %735, %v1038_v1  }
 0x296   :  { %v516_v34 = vpop.xlane.xlu1 %515 }
 0x297   :  { %v520_v35 = vsub.f32 %v511_v12, %v516_v34  ;;  %v399_v12 = vmul.f32 %v385_v24, %v1145_v31  ;;  %v548_v31 = vmul.f32 0.0625, %v547_v38 }
 0x299   :  { %v522_v36 = vmul.f32 1.442695, %v520_v35  ;;  %v423_v41 = vadd.f32 %v419_v8, %v399_v12 }
 0x29b   :  { %738 = vpow2.f32 %v522_v36 }
 0x29e   :  { %v519_v40 = vpop.xlane.xlu2 %518 }
 0x29f   :  { %v521_v3 = vsub.f32 %v512_v15, %v519_v40 }
 0x2a1   :  { %v1197_v43 = vpop.eup %738  ;;  %v524_v2 = vmul.f32 1.442695, %v521_v3 }
 0x2a2   :  { %v526_v1 = vsel %vm513_vm2, %v1197_v43, 0.0 }
 0x2a3   :  { %740 = vpow2.f32 %v524_v2  ;;  %527 = vadd.xlane.f32.xlu1 %v526_v1  ;;  %v402_v1 = vmul.f32 %v1195_v42, %v1172_v27 }
 0x2a7   :  { %v600_v44 = vpop.xlane.xlu0 %599 }
 0x2a8   :  { %v604_v47 = vsub.f32 %v596_v18, %v600_v44  ;;  %v422_v44 = vmul.f32 %v1193_v33, %v1105_v45 }
 0x2a9   :  { %v1201_v48 = vpop.eup %740 }
 0x2aa   :  { %v606_v50 = vmul.f32 1.442695, %v604_v47  ;;  %v529_v52 = vsel %vm513_vm2, %v1201_v48, 0.0 }
 0x2ab   :  { %530 = vadd.xlane.f32.xlu2 %v529_v52 }
 0x2ac   :  { %742 = vpow2.f32 %v606_v50  ;;  %v426_v50 = vadd.f32 %v422_v44, %v402_v1 }
 0x2ae   :  { %v437_v57 = vpop.permute.xlu1 %436 }
 0x2af   :  { %v603_v59 = vpop.xlane.xlu2 %602  ;;  %v445_v60 = vmul.f32 %v437_v57, %v132_v54 }
 0x2b0   :  { %v605_v61 = vsub.f32 %v597_v21, %v603_v59  ;;  %v627_v21 = vrot.slane %v626_v20, 2 }
 0x2b1   :  { %v449_v62 = vadd.f32 %v445_v60, %v425_v58 }
 0x2b2   :  { %v743_v0 = vpop.eup %742  ;;  %v608_v4 = vmul.f32 1.442695, %v605_v61  ;;  %v628_v23 = vadd.f32 %v627_v21, %v626_v20 }
 0x2b3   :  { %468 = vst.msk [vmem:[#allocation11 + $0x70] sm:$0xff] %vm239_vm0, %v449_v62  ;;  %v610_v22 = vsel %vm513_vm2, %v743_v0, 0.0 }
 0x2b4   :  { %744 = vpow2.f32 %v608_v4  ;;  %611 = vadd.xlane.f32.xlu0 %v610_v22  ;;  %v629_v24 = vrot.slane %v628_v23, 1 }
 0x2b6   :  { %v630_v25 = vadd.f32 %v629_v24, %v628_v23 }
 0x2b7   :  { %v433_v9 = vpop.permute.xlu2 %432 }
 0x2b8   :  { %v444_v11 = vmul.f32 %v433_v9, %v131_v46  ;;  %v631_v26 = vmul.f32 0.0625, %v630_v25 }
 0x2ba   :  { %v745_v14 = vpop.eup %744  ;;  %v448_v15 = vadd.f32 %v444_v11, %v424_v10  ;;  %v429_v17 = vpop.permute.xlu0 %428 }
 0x2bb   :  { %v443_v18 = vmul.f32 %v429_v17, %v130_v28  ;;  %v613_v19 = vsel %vm513_vm2, %v745_v14, 0.0 }
 0x2bc   :  { %467 = vst.msk [vmem:[#allocation11 + $0x68] sm:$0xff] %vm239_vm0, %v448_v15  ;;  %614 = vadd.xlane.f32.xlu1 %v613_v19 }
 0x2bd   :  { %v447_v37 = vadd.f32 %v443_v18, %v423_v41 }
 0x2bf   :  { %466 = vst.msk [vmem:[#allocation11 + $0x60] sm:$0xff] %vm239_vm0, %v447_v37 }
 0x2c3   :  { %550 = vrot.lane.b32.xlu2 %v548_v31, %s942_s1 }
 0x2c8   :  { %440 = vperm.xlu0 %734, %v1059_v5  }
 0x2d5   :  { %633 = vrot.lane.b32.xlu1 %v631_v26, %s942_s1 }
 0x316   :  { %v528_v29 = vpop.xlane.xlu1 %527 }
 0x317   :  { %746 = vrcp.f32 %v528_v29 }
 0x31d   :  { %v747_v30 = vpop.eup %746 }
 0x31e   :  { %v534_v32 = vmul.f32 %v747_v30, %v1197_v43  ;;  %v531_v63 = vpop.xlane.xlu2 %530 }
 0x31f   :  { %748 = vrcp.f32 %v531_v63 }
 0x320   :  { %536 = vst.msk [vmem:[%s1266_s9] sm:$0xff] %vm513_vm2, %v534_v32 }
 0x325   :  { %v749_v34 = vpop.eup %748 }
 0x326   :  { %v535_v5 = vmul.f32 %v749_v34, %v1201_v48  ;;  %v551_v35 = vpop.permute.xlu2 %550  ;;  %v133_v48 = vld [vmem:[#allocation5 + $0x58] sm:$0xff] }
 0x327   :  { %v612_v36 = vpop.xlane.xlu0 %611  ;;  %554 = vst.msk [vmem:[#allocation12] sm:$0x1] %vm553_vm3, %v551_v35 }
 0x328   :  { %537 = vst.msk [vmem:[%s1266_s9 + $0x8] sm:$0xff] %vm513_vm2, %v535_v5  ;;  %750 = vrcp.f32 %v612_v36 }
 0x32e   :  { %v751_v40 = vpop.eup %750 }
 0x32f   :  { %v618_v3 = vmul.f32 %v751_v40, %v743_v0  ;;  %v615_v43 = vpop.xlane.xlu1 %614 }
 0x330   :  { %752 = vrcp.f32 %v615_v43 }
 0x331   :  { %620 = vst.msk [vmem:[%s1266_s9 + $0x10] sm:$0xff] %vm513_vm2, %v618_v3 }
 0x336   :  { %v753_v2 = vpop.eup %752 }
 0x337   :  { %v619_v47 = vmul.f32 %v753_v2, %v745_v14 }
 0x339   :  { %621 = vst.msk [vmem:[%s1266_s9 + $0x18] sm:$0xff] %vm513_vm2, %v619_v47  ;;  %s657_s9 = sshll.u32 %s949_s24, 4  ;;  %s658_s9 = int_to_ptr.vmem [resolvable:$true] %s657_s9 }
 0x33a   :  { %v441_v49 = vpop.permute.xlu0 %440 }
 0x33b   :  { %v446_v52 = vmul.f32 %v441_v49, %v133_v48 }
 0x33d   :  { %v450_v27 = vadd.f32 %v446_v52, %v426_v50 }
 0x33f   :  { %469 = vst.msk [vmem:[#allocation11 + $0x78] sm:$0xff] %vm239_vm0, %v450_v27 }
 0x340   :  { %649 = dma.vmem_to_hbm [thread:$0]  %s642_s18, 2048, %s644_s23, [#allocation4], %s933_s21, %s933_s21, %s934_s22  }
 0x347   :  { %v634_v45 = vpop.permute.xlu1 %633 }
 0x348   :  { %636 = vst.msk [vmem:[#allocation12 + $0x1] sm:$0x1] %vm553_vm3, %v634_v45 }
 0x349   :  { %662 = dma.vmem_to_hbm [thread:$0]  %s658_s9, 32, %s660_s26, [#allocation13]  }
 0x34a   :  { %928 = dma.done.wait [#allocation4], 2048  }
 0x34b   :  { %929 = vsyncadd [#allocation4], 4294965248 }
 0x34c   :  { %930 = dma.done.wait [#allocation13], 32  }
 0x34d   :  { %931 = vsyncadd [#allocation13], 4294967264 }
 0x34e   :  { %673 = vsyncpa [#allocation3], 1 }
 0x34f   :  { %674 = vsyncpa [#allocation6], 1 }
 0x350   :  { %675 = vsyncpa [#allocation9], 1 }
 0x351   :  { %676 = vsyncpa [#allocation4], 1 }
 0x352   :  { %677 = vsyncpa [#allocation13], 1 }

</bundles_post_ra>
